<compile_context>
chip_gen: v7x
topology: tpu7x:2x2x1
jax: 0.10.0
libtpu: 0.0.40
codegen_flags: <defaults>
</compile_context>

<pallas_src>
import functools

import jax
import jax.numpy as jnp
from jax.experimental import pallas as pl
from jax.experimental.pallas import tpu as pltpu


def _adain_kernel(x_ref, y_ref, o_ref, *, eps):
    # x_ref: (TR, Nx), y_ref: (TR, Ny), o_ref: (TR, Nx); one row == one (b, c).
    x = x_ref[...].astype(jnp.float32)
    y = y_ref[...].astype(jnp.float32)

    nx = x.shape[-1]
    ny = y.shape[-1]

    # Content (x) statistics per row (two-pass: accurate, matches torch.var).
    x_mean = jnp.sum(x, axis=-1, keepdims=True) * (1.0 / nx)
    xc = x - x_mean
    x_var = jnp.sum(xc * xc, axis=-1, keepdims=True) / float(max(nx - 1, 1))
    if nx == 1:
        # torch .var(unbiased=True) with a single element -> NaN; keep parity.
        x_var = x_var * jnp.nan

    # Style (y) statistics per row.
    y_mean = jnp.sum(y, axis=-1, keepdims=True) * (1.0 / ny)
    yc = y - y_mean
    y_var = jnp.sum(yc * yc, axis=-1, keepdims=True) / float(max(ny - 1, 1))
    if ny == 1:
        y_var = y_var * jnp.nan

    # Fold into a per-row scale (y_std / x_std): sqrt/divide only touch the
    # (TR, 1) column vectors; the per-element path below is one broadcast FMA.
    scale = jnp.sqrt((y_var + eps) / (x_var + eps))

    # out = (x - x_mean) * (y_std / x_std) + y_mean  (reuses centered xc).
    o_ref[...] = (xc * scale + y_mean).astype(o_ref.dtype)


def _pick_row_tile(rows, nx, ny, itemsize):
    """Rows per grid step: a multiple of 8 (sublane-full f32 tiles), sized so
    double-buffered x/y/out blocks stay well under the default scoped VMEM
    limit on all generations (v7x has only 64 MiB physical / 32 MiB scoped)."""
    budget = 8 * 1024 * 1024              # resident bytes per pipeline stage
    per_row = (2 * nx + ny) * itemsize    # x block + out block + y block
    tr = max(8, (budget // (2 * max(per_row, 1))) // 8 * 8)
    rows8 = ((rows + 7) // 8) * 8
    if rows8 >= 16:
        # Keep at least 2 grid steps so software pipelining and megacore
        # ("parallel") sharding have something to split.
        tr = min(tr, max(8, (rows8 // 2) // 8 * 8))
    return int(min(tr, rows8))


def adain(x, y, eps=1e-5):
    """AdaIN forward. x: (bs, ch, H, W); y: (bs, ch, Hy, Wy) (any spatial)."""
    assert x.shape[0] == y.shape[0]
    assert x.shape[1] == y.shape[1]
    bs, ch = x.shape[:2]
    nx = 1
    for d in x.shape[2:]:
        nx *= int(d)
    ny = 1
    for d in y.shape[2:]:
        ny *= int(d)

    rows = bs * ch
    x_flat = x.reshape(rows, nx)
    y_flat = y.reshape(rows, ny)

    itemsize = jnp.dtype(x.dtype).itemsize
    tr = _pick_row_tile(rows, nx, ny, itemsize)
    rows_padded = ((rows + tr - 1) // tr) * tr
    if rows_padded != rows:
        pad = rows_padded - rows
        # Zero rows are harmless: var=0 -> scale=1, out=0; sliced off below.
        x_flat = jnp.pad(x_flat, ((0, pad), (0, 0)))
        y_flat = jnp.pad(y_flat, ((0, pad), (0, 0)))

    kernel = functools.partial(_adain_kernel, eps=eps)

    out_flat = pl.pallas_call(
        kernel,
        out_shape=jax.ShapeDtypeStruct((rows_padded, nx), x.dtype),
        grid_spec=pltpu.PrefetchScalarGridSpec(
            num_scalar_prefetch=0,
            grid=(rows_padded // tr,),
            in_specs=[
                pl.BlockSpec((tr, nx), lambda r: (r, 0)),
                pl.BlockSpec((tr, ny), lambda r: (r, 0)),
            ],
            out_specs=pl.BlockSpec((tr, nx), lambda r: (r, 0)),
        ),
        compiler_params=pltpu.CompilerParams(
            dimension_semantics=("parallel",),
        ),
    )(x_flat, y_flat)

    if rows_padded != rows:
        out_flat = out_flat[:rows]
    return out_flat.reshape(x.shape)


def _adain_ref(x, y, eps=1e-5):
    bs, ch = x.shape[:2]
    x_ = x.reshape(bs, ch, -1)
    y_ = y.reshape(bs, ch, -1)

    def stats(v):
        var = jnp.var(v, axis=-1, ddof=1) + eps  # unbiased, like torch .var()
        std = jnp.sqrt(var).reshape(bs, ch, 1, 1)
        mean = jnp.mean(v, axis=-1).reshape(bs, ch, 1, 1)
        return std, mean

    x_std, x_mean = stats(x_)
    y_std, y_mean = stats(y_)
    return (x - x_mean) / x_std * y_std + y_mean


if __name__ == "__main__":
    key = jax.random.PRNGKey(0)
    kx, ky, kz = jax.random.split(key, 3)

    # Case 1: matching spatial sizes.
    bs, ch, H, W = 2, 4, 16, 16
    x = jax.random.normal(kx, (bs, ch, H, W), dtype=jnp.float32) * 2.0 + 0.5
    y = jax.random.normal(ky, (bs, ch, H, W), dtype=jnp.float32) * 0.7 - 1.0

    out = jax.block_until_ready(adain(x, y))
    ref = _adain_ref(x, y)
    assert out.shape == x.shape
    assert jnp.allclose(out, ref, atol=1e-5, rtol=1e-5), "mismatch vs reference (case 1)"

    # Case 2: style input with a different spatial size (module supports it).
    y2 = jax.random.normal(kz, (bs, ch, 8, 8), dtype=jnp.float32) * 1.3 + 0.2
    out2 = jax.block_until_ready(adain(x, y2))
    ref2 = _adain_ref(x, y2)
    assert jnp.allclose(out2, ref2, atol=1e-5, rtol=1e-5), "mismatch vs reference (case 2)"

    print("KERNEL_OK")
</pallas_src>

<mosaic_0001>
module attributes {stable_mosaic.version = 11 : i64} {
  func.func @_adain_kernel(%arg0: i32, %arg1: memref<8x256xf32, #tpu.memory_space<vmem>>, %arg2: memref<8x256xf32, #tpu.memory_space<vmem>>, %arg3: memref<8x256xf32, #tpu.memory_space<vmem>>) attributes {dimension_semantics = [#tpu.dimension_semantics<parallel>], iteration_bounds = array<i64: 1>, scalar_prefetch = 0 : i64, scratch_operands = 0 : i64, tpu.core_type = #tpu.core_type<tc>, window_params = [{transform_indices = @transform_0, window_bounds = array<i64: 8, 256>}, {transform_indices = @transform_1, window_bounds = array<i64: 8, 256>}, {transform_indices = @transform_2, window_bounds = array<i64: 8, 256>}]} {
    %c0 = arith.constant 0 : index
    %c0_0 = arith.constant 0 : index
    %0 = vector.load %arg1[%c0, %c0_0] : memref<8x256xf32, #tpu.memory_space<vmem>>, vector<8x256xf32>
    %c0_1 = arith.constant 0 : index
    %c0_2 = arith.constant 0 : index
    %1 = vector.load %arg2[%c0_1, %c0_2] : memref<8x256xf32, #tpu.memory_space<vmem>>, vector<8x256xf32>
    %cst = arith.constant dense<0.000000e+00> : vector<8xf32>
    %2 = vector.multi_reduction <add>, %0, %cst [1] : vector<8x256xf32> to vector<8xf32>
    %3 = vector.shape_cast %2 : vector<8xf32> to vector<8x1xf32>
    %cst_3 = arith.constant 3.906250e-03 : f32
    %4 = vector.broadcast %cst_3 : f32 to vector<8x1xf32>
    %5 = arith.mulf %3, %4 : vector<8x1xf32>
    %6 = vector.broadcast %5 : vector<8x1xf32> to vector<8x256xf32>
    %7 = arith.subf %0, %6 : vector<8x256xf32>
    %8 = arith.mulf %7, %7 : vector<8x256xf32>
    %cst_4 = arith.constant dense<0.000000e+00> : vector<8xf32>
    %9 = vector.multi_reduction <add>, %8, %cst_4 [1] : vector<8x256xf32> to vector<8xf32>
    %10 = vector.shape_cast %9 : vector<8xf32> to vector<8x1xf32>
    %cst_5 = arith.constant 2.550000e+02 : f32
    %11 = vector.broadcast %cst_5 : f32 to vector<8x1xf32>
    %12 = arith.divf %10, %11 : vector<8x1xf32>
    %cst_6 = arith.constant dense<0.000000e+00> : vector<8xf32>
    %13 = vector.multi_reduction <add>, %1, %cst_6 [1] : vector<8x256xf32> to vector<8xf32>
    %14 = vector.shape_cast %13 : vector<8xf32> to vector<8x1xf32>
    %cst_7 = arith.constant 3.906250e-03 : f32
    %15 = vector.broadcast %cst_7 : f32 to vector<8x1xf32>
    %16 = arith.mulf %14, %15 : vector<8x1xf32>
    %17 = vector.broadcast %16 : vector<8x1xf32> to vector<8x256xf32>
    %18 = arith.subf %1, %17 : vector<8x256xf32>
    %19 = arith.mulf %18, %18 : vector<8x256xf32>
    %cst_8 = arith.constant dense<0.000000e+00> : vector<8xf32>
    %20 = vector.multi_reduction <add>, %19, %cst_8 [1] : vector<8x256xf32> to vector<8xf32>
    %21 = vector.shape_cast %20 : vector<8xf32> to vector<8x1xf32>
    %cst_9 = arith.constant 2.550000e+02 : f32
    %22 = vector.broadcast %cst_9 : f32 to vector<8x1xf32>
    %23 = arith.divf %21, %22 : vector<8x1xf32>
    %cst_10 = arith.constant 9.99999974E-6 : f32
    %24 = vector.broadcast %cst_10 : f32 to vector<8x1xf32>
    %25 = arith.addf %23, %24 : vector<8x1xf32>
    %cst_11 = arith.constant 9.99999974E-6 : f32
    %26 = vector.broadcast %cst_11 : f32 to vector<8x1xf32>
    %27 = arith.addf %12, %26 : vector<8x1xf32>
    %28 = arith.divf %25, %27 : vector<8x1xf32>
    %29 = math.sqrt %28 : vector<8x1xf32>
    %30 = vector.broadcast %29 : vector<8x1xf32> to vector<8x256xf32>
    %31 = arith.mulf %7, %30 : vector<8x256xf32>
    %32 = vector.broadcast %16 : vector<8x1xf32> to vector<8x256xf32>
    %33 = arith.addf %31, %32 : vector<8x256xf32>
    %c0_12 = arith.constant 0 : index
    %c0_13 = arith.constant 0 : index
    %34 = vector.load %arg3[%c0_12, %c0_13] : memref<8x256xf32, #tpu.memory_space<vmem>>, vector<8x256xf32>
    tpu.vector_store %arg3[%c0_12, %c0_13], %33 {strides = array<i32>} : memref<8x256xf32, #tpu.memory_space<vmem>>, vector<8x256xf32>,
    return
  }
  func.func @transform_0(%arg0: i32) -> (i32, i32) {
    %c0_i32 = arith.constant 0 : i32
    %c0_i32_0 = arith.constant 0 : i32
    return %arg0, %c0_i32 : i32, i32
  }
  func.func @transform_1(%arg0: i32) -> (i32, i32) {
    %c0_i32 = arith.constant 0 : i32
    %c0_i32_0 = arith.constant 0 : i32
    return %arg0, %c0_i32 : i32, i32
  }
  func.func @transform_2(%arg0: i32) -> (i32, i32) {
    %c0_i32 = arith.constant 0 : i32
    %c0_i32_0 = arith.constant 0 : i32
    return %arg0, %c0_i32 : i32, i32
  }
}

</mosaic_0001>

<bundles_post_ra>
// kernel: tpu_custom_call.1
= control target key start
LH: loop header
LB: loop body
LE: loop exit
PB: predicated region body
PF: predicated region fallthrough
CT: control target
= control target key end

     0   :  { %7 = vsyncpa [#allocation3], 0  ;;  %s231_s0 = inlined_call_operand.hbm [shape: f32[8,256], index: 0, kind: input, shape index: {}]   ;;  %s232_s1 = inlined_call_operand.hbm [shape: f32[8,256], index: 1, kind: input, shape index: {}]   ;;  %s233_s2 = inlined_call_operand.hbm [shape: f32[8,256], index: 2, kind: output, shape index: {}]  }
   0x1   :  { %8 = vsyncpa [#allocation6], 0 }
   0x2   :  { %9 = vsyncpa [#allocation4], 0  ;;  %s177_s9 = smov [#allocation2]   ;;  %s178_s11 = smov [#allocation5]  }
   0x3   :  { %s16_s10 = sshll.u32 %s177_s9, 4  ;;  %s26_s12 = sshll.u32 %s178_s11, 4  ;;  %s17_s10 = int_to_ptr.vmem [resolvable:$true] %s16_s10  ;;  %s27_s12 = int_to_ptr.vmem [resolvable:$true] %s26_s12 }
   0x4   :  { %s105_s15 = scalar_lea.hbm %s231_s0, 256 }
   0x5   :  { %p106_p0 = scmp.ne.s32.totalorder %s231_s0, %s105_s15  ;;  %p109_p1 = scmp.lt.u32.totalorder %s105_s15, %s231_s0 }
   0x7   :  { %p111_p2 = pnand %p109_p1, %p106_p0 }
   0x9   :  { %114 = shalt.err (!%p111_p2)
}
   0xa   :  { %s115_s20 = scalar_lea.vmem %s17_s10, 256  ;;  %p120_p4 = scmp.lt.s32.totalorder %s17_s10, %s17_s10 }
   0xb   :  { %p116_p3 = scmp.ne.s32.totalorder %s17_s10, %s115_s20  ;;  %p121_p5 = scmp.lt.s32.totalorder %s115_s20, %s115_s20 }
   0xd   :  { %p122_p6 = por %p121_p5, %p120_p4 }
   0xf   :  { %p123_p7 = pnand %p122_p6, %p116_p3 }
  0x11   :  { %126 = shalt.err (!%p123_p7)
}
  0x12   :  { %19 = dma.hbm_to_vmem [thread:$0]  %s231_s0, 256, %s17_s10, [#allocation3]  }
  0x13   :  { %s127_s25 = scalar_lea.hbm %s232_s1, 256 }
  0x14   :  { %p128_p8 = scmp.ne.s32.totalorder %s232_s1, %s127_s25  ;;  %p131_p9 = scmp.lt.u32.totalorder %s127_s25, %s232_s1 }
  0x16   :  { %p133_p10 = pnand %p131_p9, %p128_p8 }
  0x18   :  { %136 = shalt.err (!%p133_p10)
}
  0x19   :  { %s137_s30 = scalar_lea.vmem %s27_s12, 256  ;;  %p142_p12 = scmp.lt.s32.totalorder %s27_s12, %s27_s12 }
  0x1a   :  { %p138_p11 = scmp.ne.s32.totalorder %s27_s12, %s137_s30  ;;  %p143_p13 = scmp.lt.s32.totalorder %s137_s30, %s137_s30 }
  0x1c   :  { %p144_p0 = por %p143_p13, %p142_p12 }
  0x1e   :  { %p145_p1 = pnand %p144_p0, %p138_p11 }
  0x20   :  { %148 = shalt.err (!%p145_p1)
}
  0x21   :  { %29 = dma.hbm_to_vmem [thread:$0]  %s232_s1, 256, %s27_s12, [#allocation6]  }
  0x22   :  { %171 = dma.done.wait [#allocation3], 256  }
  0x23   :  { %172 = vsyncadd [#allocation3], 4294967040 }
  0x24   :  { %173 = dma.done.wait [#allocation6], 256  }
  0x25   :  { %174 = vsyncadd [#allocation6], 4294967040  ;;  %v36_v0 = vld [vmem:[#allocation2] sm:$0xff]  ;;  %v37_v1 = vld [vmem:[#allocation2 + $0x8] sm:$0xff]  ;;  %s179_s1 = smov [#allocation7]  }
  0x26   :  { %v38_v2 = vld [vmem:[#allocation5] sm:$0xff]  ;;  %v40_v3 = vadd.f32 %v37_v1, %v36_v0  ;;  %v39_v4 = vld [vmem:[#allocation5 + $0x8] sm:$0xff]  ;;  %s88_s4 = sshll.u32 %s179_s1, 4  ;;  %s89_s4 = int_to_ptr.vmem [resolvable:$true] %s88_s4 }
  0x27   :  { %v53_v5 = vadd.f32 %v39_v4, %v38_v2  ;;  %s149_s5 = scalar_lea.vmem %s89_s4, 256  ;;  %p154_p3 = scmp.lt.s32.totalorder %s89_s4, %s89_s4 }
  0x28   :  { %41 = vadd.xlane.f32.xlu0 %v40_v3  ;;  %p150_p2 = scmp.ne.s32.totalorder %s89_s4, %s149_s5  ;;  %p155_p4 = scmp.lt.s32.totalorder %s149_s5, %s149_s5 }
  0x2a   :  { %p156_p5 = por %p155_p4, %p154_p3 }
  0x2c   :  { %54 = vadd.xlane.f32.xlu0 %v53_v5  ;;  %p157_p6 = pnand %p156_p5, %p150_p2 }
  0xb5   :  { %v42_v6 = vpop.xlane.xlu0 %41 }
  0xb6   :  { %v43_v7 = vmul.f32 0.00390625, %v42_v6 }
  0xb8   :  { %v44_v8 = vsub.f32 %v36_v0, %v43_v7  ;;  %v45_v9 = vsub.f32 %v37_v1, %v43_v7 }
  0xb9   :  { %v55_v10 = vpop.xlane.xlu0 %54 }
  0xba   :  { %v46_v11 = vmul.f32 %v44_v8, %v44_v8  ;;  %v47_v12 = vmul.f32 %v45_v9, %v45_v9  ;;  %v56_v13 = vmul.f32 0.00390625, %v55_v10 }
  0xbc   :  { %v48_v14 = vadd.f32 %v47_v12, %v46_v11  ;;  %v57_v15 = vsub.f32 %v38_v2, %v56_v13  ;;  %v58_v16 = vsub.f32 %v39_v4, %v56_v13 }
  0xbe   :  { %49 = vadd.xlane.f32.xlu1 %v48_v14  ;;  %v59_v17 = vmul.f32 %v57_v15, %v57_v15  ;;  %v60_v18 = vmul.f32 %v58_v16, %v58_v16 }
  0xc0   :  { %v61_v19 = vadd.f32 %v60_v18, %v59_v17 }
  0xc2   :  { %62 = vadd.xlane.f32.xlu1 %v61_v19 }
 0x14b   :  { %v50_v20 = vpop.xlane.xlu1 %49 }
 0x14c   :  { %v52_v21 = vmul.f32 0.003921569, %v50_v20 }
 0x14e   :  { %v66_v22 = vadd.f32 1e-05, %v52_v21 }
 0x14f   :  { %v63_v23 = vpop.xlane.xlu1 %62 }
 0x150   :  { %101 = vrcp.f32 %v66_v22  ;;  %v64_v24 = vmul.f32 0.003921569, %v63_v23 }
 0x152   :  { %v65_v25 = vadd.f32 1e-05, %v64_v24 }
 0x15a   :  { %v102_v26 = vpop.eup %101 }
 0x15b   :  { %v68_v27 = vmul.f32 %v102_v26, %v65_v25 }
 0x15d   :  { %103 = vrsqrt.f32 %v68_v27  ;;  %vm71_vm0 = vcmp.eq.f32.partialorder %v68_v27, inf  ;;  %v74_v30 = vand.u32 2147483648, %v68_v27  ;;  %vm73_vm1 = vcmp.eq.f32.partialorder %v68_v27, 0.0 }
 0x167   :  { %v104_v28 = vpop.eup %103 }
 0x168   :  { %v70_v29 = vmul.f32 %v104_v28, %v68_v27 }
 0x16a   :  { %v72_v31 = vsel %vm71_vm0, %v68_v27, %v70_v29 }
 0x16b   :  { %v75_v32 = vsel %vm73_vm1, %v74_v30, %v72_v31 }
 0x16c   :  { %v76_v33 = vmul.f32 %v75_v32, %v44_v8  ;;  %v77_v34 = vmul.f32 %v75_v32, %v45_v9 }
 0x16e   :  { %v78_v35 = vadd.f32 %v76_v33, %v56_v13  ;;  %v79_v36 = vadd.f32 %v77_v34, %v56_v13 }
 0x170   :  { %80 = vst [vmem:[#allocation7] sm:$0xff] %v78_v35  ;;  %81 = vst [vmem:[#allocation7 + $0x8] sm:$0xff] %v79_v36 }
 0x171   :  { %160 = shalt.err (!%p157_p6)
}
 0x172   :  { %s161_s8 = scalar_lea.hbm %s233_s2, 256 }
 0x173   :  { %p162_p7 = scmp.ne.s32.totalorder %s233_s2, %s161_s8  ;;  %p165_p8 = scmp.lt.u32.totalorder %s161_s8, %s233_s2 }
 0x175   :  { %p167_p9 = pnand %p165_p8, %p162_p7 }
 0x177   :  { %170 = shalt.err (!%p167_p9)
}
 0x178   :  { %91 = dma.vmem_to_hbm [thread:$0]  %s89_s4, 256, %s233_s2, [#allocation4]  }
 0x179   :  { %175 = dma.done.wait [#allocation4], 256  }
 0x17a   :  { %176 = vsyncadd [#allocation4], 4294967040 }
 0x17b   :  { %95 = vsyncpa [#allocation3], 1 }
 0x17c   :  { %96 = vsyncpa [#allocation6], 1 }
 0x17d   :  { %97 = vsyncpa [#allocation4], 1 }

</bundles_post_ra>
